<compile_context>
chip_gen: v7x
topology: tpu7x:2x2x1
jax: 0.10.0
libtpu: 0.0.40
codegen_flags: <defaults>
</compile_context>

<pallas_src>
import numpy as np

import jax
import jax.numpy as jnp
from jax.experimental import pallas as pl
from jax.experimental.pallas import tpu as pltpu

IN_FEATURES = 4
OUT_FEATURES = 3


def _round_up(a: int, b: int) -> int:
    return ((a + b - 1) // b) * b


def _select_pack() -> int:
    """Lane-packing factor per TPU generation (see header)."""
    try:
        kind = jax.devices()[0].device_kind.lower()
    except Exception:  # pragma: no cover - no accelerator visible
        return 32
    if "v6" in kind or "v7" in kind or "7x" in kind:
        return 128
    return 32  # v5e and older: keep MXU work low, stay HBM-bound


def _default_row_tile(pack: int) -> int:
    # ~4 MB of packed f32 input per grid step.
    return 2048 if pack >= 128 else 4096


def _packed_linear_kernel(x_ref, w_ref, o_ref):
    # x_ref: [tile, PACK*4]   packed input rows
    # w_ref: [PACK*4, PACK*3] block-diagonal W^T (constant block index -> resident)
    # o_ref: [tile, PACK*3]   packed output rows
    # NOTE(precision): f32 x f32 on the MXU lowers to multi-pass bf16; verified
    # against the pure-f32 reference at atol=1e-5 in the sandbox run.  If a
    # generation ever deviates, add precision=jax.lax.Precision.HIGHEST here.
    o_ref[...] = jnp.dot(
        x_ref[...], w_ref[...], preferred_element_type=jnp.float32
    ).astype(o_ref.dtype)


def _block_diag_weight(weight, pack: int):
    """[pack*4, pack*3] block-diagonal weight: `pack` copies of W^T (4x3)."""
    try:
        # Concrete weight: build the constant on the host (no per-call device HLO).
        w_np = np.asarray(weight, dtype=np.float32)
        return jnp.asarray(np.kron(np.eye(pack, dtype=np.float32), w_np.T))
    except Exception:
        # Traced weight (inside jit): tiny one-off kron on device.
        return jnp.kron(jnp.eye(pack, dtype=jnp.float32),
                        weight.T.astype(jnp.float32))


def decoder_forward(x: jax.Array, weight: jax.Array,
                    *, pack: int | None = None,
                    row_tile: int | None = None) -> jax.Array:
    """Equivalent of PyTorch Decoder.forward.

    x:      [..., 4]  float32
    weight: [3, 4]    float32 (PyTorch nn.Linear layout [out, in])
    returns [..., 3]  float32
    """
    assert weight.shape == (OUT_FEATURES, IN_FEATURES)
    assert x.shape[-1] == IN_FEATURES

    if pack is None:
        pack = _select_pack()
    if row_tile is None:
        row_tile = _default_row_tile(pack)
    packed_in = pack * IN_FEATURES
    packed_out = pack * OUT_FEATURES

    lead_shape = x.shape[:-1]
    x2d = x.reshape(-1, IN_FEATURES).astype(jnp.float32)
    n = x2d.shape[0]
    if n == 0:
        return jnp.zeros((*lead_shape, OUT_FEATURES), jnp.float32)

    # --- pad only to a multiple of 8 packed rows; skip entirely when aligned ---
    pad_unit = pack * 8
    n_pad = _round_up(n, pad_unit)
    if n_pad != n:
        x2d = jnp.pad(x2d, ((0, n_pad - n), (0, 0)))
    n_packed = n_pad // pack
    x_packed = x2d.reshape(n_packed, packed_in)        # free, contiguous reshape

    # --- tiling: big tiles, cdiv grid with masked ragged edge, >=2 steps if possible ---
    tile = min(row_tile, _round_up(n_packed, 8))
    if n_packed > 8:
        # keep at least 2 grid steps so v7x's two TensorCores both get work
        tile = min(tile, _round_up(pl.cdiv(n_packed, 2), 8))
    tile = max(tile, 8)
    grid = pl.cdiv(n_packed, tile)

    w_block = _block_diag_weight(weight, pack)         # [packed_in, packed_out]

    # Double-buffered input/output blocks + double-buffered weight + slack.
    block_bytes = tile * (packed_in + packed_out) * 4
    weight_bytes = packed_in * packed_out * 4
    vmem_limit = max(32 << 20, 2 * block_bytes + 2 * weight_bytes + (4 << 20))
    vmem_limit = min(vmem_limit, 96 << 20)

    out_packed = pl.pallas_call(
        _packed_linear_kernel,
        out_shape=jax.ShapeDtypeStruct((n_packed, packed_out), jnp.float32),
        grid_spec=pl.GridSpec(
            grid=(grid,),
            in_specs=[
                # row-tiled packed input: double-buffered by the auto pipeline
                pl.BlockSpec((tile, packed_in), lambda i: (i, 0)),
                # block-diagonal weight: constant block index -> stays resident
                pl.BlockSpec((packed_in, packed_out), lambda i: (0, 0)),
            ],
            out_specs=pl.BlockSpec((tile, packed_out), lambda i: (i, 0)),
        ),
        compiler_params=pltpu.CompilerParams(
            # rows are independent -> shard grid steps across v7x's two TensorCores
            dimension_semantics=("parallel",),
            vmem_limit_bytes=int(vmem_limit),
        ),
        cost_estimate=pl.CostEstimate(
            # dense block-diag matmul actually executed (incl. masked edge block)
            flops=2 * grid * tile * packed_in * packed_out,
            transcendentals=0,
            bytes_accessed=4 * (n_packed * (packed_in + packed_out)
                                + packed_in * packed_out),
        ),
    )(x_packed, w_block)

    out = out_packed.reshape(n_pad, OUT_FEATURES)      # free reshape
    if n_pad != n:
        out = out[:n]                                  # slice only when padded
    return out.reshape(*lead_shape, OUT_FEATURES)


if __name__ == "__main__":
    key = jax.random.PRNGKey(0)
    k_x, k_w, k_x2 = jax.random.split(key, 3)

    # Small shapes consistent with the module: batch=2, seq=16, in_features=4.
    x = jax.random.normal(k_x, (2, 16, 4), dtype=jnp.float32)

    # Deterministic synthetic weight, PyTorch layout [out_features=3, in_features=4],
    # matching nn.Linear's uniform(-1/sqrt(in), 1/sqrt(in)) init range.
    bound = 1.0 / jnp.sqrt(4.0)
    weight = jax.random.uniform(
        k_w, (3, 4), dtype=jnp.float32, minval=-bound, maxval=bound
    )

    out = decoder_forward(x, weight)
    jax.block_until_ready(out)
    ref = x @ weight.T
    assert out.shape == (2, 16, 3)
    assert jnp.allclose(out, ref, atol=1e-5, rtol=1e-5)

    # Larger ragged batch: exercises the cdiv grid, the masked edge block and the
    # multi-step (>=2 grid steps) path.
    x2 = jax.random.normal(k_x2, (3000, 4), dtype=jnp.float32)
    out2 = decoder_forward(x2, weight)
    jax.block_until_ready(out2)
    ref2 = x2 @ weight.T
    assert out2.shape == (3000, 3)
    assert jnp.allclose(out2, ref2, atol=1e-5, rtol=1e-5)

    print("KERNEL_OK")
</pallas_src>

<mosaic_0001>
module attributes {stable_mosaic.version = 11 : i64} {
  func.func @_packed_linear_kernel(%arg0: i32, %arg1: memref<8x128xf32, #tpu.memory_space<vmem>>, %arg2: memref<128x96xf32, #tpu.memory_space<vmem>>, %arg3: memref<8x96xf32, #tpu.memory_space<vmem>>) attributes {dimension_semantics = [#tpu.dimension_semantics<parallel>], iteration_bounds = array<i64: 1>, scalar_prefetch = 0 : i64, scratch_operands = 0 : i64, tpu.core_type = #tpu.core_type<tc>, window_params = [{transform_indices = @transform_0, window_bounds = array<i64: 8, 128>}, {pipeline_mode = #tpu.pipeline_mode<synchronous>, transform_indices = @transform_1, window_bounds = array<i64: 128, 96>}, {transform_indices = @transform_2, window_bounds = array<i64: 8, 96>}]} {
    %c0 = arith.constant 0 : index
    %c0_0 = arith.constant 0 : index
    %0 = vector.load %arg1[%c0, %c0_0] : memref<8x128xf32, #tpu.memory_space<vmem>>, vector<8x128xf32>
    %c0_1 = arith.constant 0 : index
    %c0_2 = arith.constant 0 : index
    %1 = vector.load %arg2[%c0_1, %c0_2] : memref<128x96xf32, #tpu.memory_space<vmem>>, vector<128x96xf32>
    %cst = arith.constant dense<0.000000e+00> : vector<8x96xf32>
    %2 = tpu.matmul %0, %1, %cst {dimension_numbers = #tpu.dot_dimension_numbers<[1], [0], [0], [1], [0, 0, 1, 1], [], []>} : vector<8x128xf32>, vector<128x96xf32>, vector<8x96xf32> -> vector<8x96xf32>
    %c0_3 = arith.constant 0 : index
    %c0_4 = arith.constant 0 : index
    %3 = vector.load %arg3[%c0_3, %c0_4] : memref<8x96xf32, #tpu.memory_space<vmem>>, vector<8x96xf32>
    tpu.vector_store %arg3[%c0_3, %c0_4], %2 {strides = array<i32>} : memref<8x96xf32, #tpu.memory_space<vmem>>, vector<8x96xf32>,
    return
  }
  func.func @transform_0(%arg0: i32) -> (i32, i32) {
    %c0_i32 = arith.constant 0 : i32
    %c0_i32_0 = arith.constant 0 : i32
    return %arg0, %c0_i32 : i32, i32
  }
  func.func @transform_1(%arg0: i32) -> (i32, i32) {
    %c0_i32 = arith.constant 0 : i32
    %c0_i32_0 = arith.constant 0 : i32
    %c0_i32_1 = arith.constant 0 : i32
    return %c0_i32, %c0_i32_0 : i32, i32
  }
  func.func @transform_2(%arg0: i32) -> (i32, i32) {
    %c0_i32 = arith.constant 0 : i32
    %c0_i32_0 = arith.constant 0 : i32
    return %arg0, %c0_i32 : i32, i32
  }
}

</mosaic_0001>

<bundles_post_ra>
// kernel: tpu_custom_call.1
= control target key start
LH: loop header
LB: loop body
LE: loop exit
PB: predicated region body
PF: predicated region fallthrough
CT: control target
= control target key end

     0   :  { %v219_v3 = vmov 0.0|0.0   ;;  %vm220_vm0 = vmmov 0   ;;  %v221_v6 = vmov 0.0   ;;  %s301_s0 = inlined_call_operand.vmem [shape: f32[8,128], index: 0, kind: input, shape index: {}]   ;;  %s302_s1 = inlined_call_operand.vmem [shape: f32[128,96], index: 1, kind: input, shape index: {}]   ;;  %s303_s2 = inlined_call_operand.hbm [shape: f32[8,96], index: 2, kind: output, shape index: {}]  }
   0x1   :  { %v13_v0 = vld [vmem:[%s302_s1] sm:$0xff]  ;;  %v14_v1 = vld [vmem:[%s302_s1 + $0x8] sm:$0xff]  ;;  %v15_v2 = vld [vmem:[%s302_s1 + $0x10] sm:$0xff]  ;;  %167 = vmatprep.subr.bf16.mxu0 %v219_v3  ;;  %164 = vmatprep.mubr.msk.f32.mxu0 %vm220_vm0, %v221_v6 }
   0x2   :  { %v168_v4 = vpack.c.bf16 %v14_v1, %v13_v0  ;;  %v16_v5 = vld [vmem:[%s302_s1 + $0x18] sm:$0xff]  ;;  %v17_v8 = vld [vmem:[%s302_s1 + $0x20] sm:$0xff]  ;;  %v18_v9 = vld [vmem:[%s302_s1 + $0x28] sm:$0xff] }
   0x3   :  { %v171_v7 = vpack.c.bf16 %v16_v5, %v15_v2 }
   0x4   :  { %169 = vmatpush3.bf16.msra.mxu0 %v168_v4 }
   0x5   :  { %170 = vmatprep.subr.bf16.mxu0 %v219_v3 }
   0x6   :  { %7 = vsyncpa [#allocation3], 0  ;;  %v174_v10 = vpack.c.bf16 %v18_v9, %v17_v8  ;;  %v19_v11 = vld [vmem:[%s302_s1 + $0x30] sm:$0xff]  ;;  %v20_v12 = vld [vmem:[%s302_s1 + $0x38] sm:$0xff]  ;;  %s222_s15 = smov [#allocation2]   ;;  %vm99_vm1 = vcmask 785408  }
   0x7   :  { %v177_v13 = vpack.c.bf16 %v20_v12, %v19_v11  ;;  %v21_v14 = vld [vmem:[%s302_s1 + $0x40] sm:$0xff]  ;;  %v22_v15 = vld [vmem:[%s302_s1 + $0x48] sm:$0xff]  ;;  %v23_v17 = vld [vmem:[%s302_s1 + $0x50] sm:$0xff]  ;;  %s107_s16 = sshll.u32 %s222_s15, 4  ;;  %s108_s16 = int_to_ptr.vmem [resolvable:$true] %s107_s16 }
   0x8   :  { %172 = vmatpush3.bf16.msra.mxu0 %v171_v7  ;;  %v180_v16 = vpack.c.bf16 %v22_v15, %v21_v14  ;;  %v24_v18 = vld [vmem:[%s302_s1 + $0x58] sm:$0xff]  ;;  %v25_v20 = vld [vmem:[%s302_s1 + $0x60] sm:$0xff]  ;;  %v26_v21 = vld [vmem:[%s302_s1 + $0x68] sm:$0xff]  ;;  %s195_s17 = scalar_lea.vmem %s108_s16, 128  ;;  %p200_p1 = scmp.lt.s32.totalorder %s108_s16, %s108_s16 }
   0x9   :  { %173 = vmatprep.subr.bf16.mxu0 %v219_v3  ;;  %v183_v19 = vpack.c.bf16 %v24_v18, %v23_v17  ;;  %v186_v22 = vpack.c.bf16 %v26_v21, %v25_v20  ;;  %v27_v23 = vld [vmem:[%s302_s1 + $0x70] sm:$0xff]  ;;  %v28_v24 = vld [vmem:[%s302_s1 + $0x78] sm:$0xff]  ;;  %v12_v26 = vld [vmem:[%s301_s0] sm:$0xff]  ;;  %p196_p0 = scmp.ne.s32.totalorder %s108_s16, %s195_s17  ;;  %p201_p2 = scmp.lt.s32.totalorder %s195_s17, %s195_s17 }
   0xa   :  { %v189_v25 = vpack.c.bf16 %v28_v24, %v27_v23 }
   0xb   :  { %p202_p3 = por %p201_p2, %p200_p1 }
   0xc   :  { %175 = vmatpush3.bf16.msra.mxu0 %v174_v10 }
   0xd   :  { %176 = vmatprep.subr.bf16.mxu0 %v219_v3  ;;  %p203_p4 = pnand %p202_p3, %p196_p0 }
  0x10   :  { %178 = vmatpush3.bf16.msra.mxu0 %v177_v13 }
  0x11   :  { %179 = vmatprep.subr.bf16.mxu0 %v219_v3 }
  0x14   :  { %181 = vmatpush3.bf16.msra.mxu0 %v180_v16 }
  0x15   :  { %182 = vmatprep.subr.bf16.mxu0 %v219_v3 }
  0x18   :  { %184 = vmatpush3.bf16.msra.mxu0 %v183_v19 }
  0x19   :  { %185 = vmatprep.subr.bf16.mxu0 %v219_v3 }
  0x1c   :  { %187 = vmatpush3.bf16.msra.mxu0 %v186_v22 }
  0x1d   :  { %188 = vmatprep.subr.bf16.mxu0 %v219_v3 }
  0x20   :  { %190 = vmatpush3.bf16.msra.mxu0 %v189_v25 }
  0x23   :  { %165 = vmatmul.mubr.f32.vlgmr.msra.gmra.mrb[0].mxu0 %v12_v26 }
  0xf6   :  { %v95_v27 = vpop.f32.mrb[0].mxu0 }
  0xf7   :  { %100 = vst.msk [vmem:[#allocation2] sm:$0xff] %vm99_vm1, %v95_v27  ;;  %v166_v28 = vpop.f32.mrb[1].mxu0 }
  0xf8   :  { %206 = shalt.err (!%p203_p4)
}
  0xf9   :  { %s207_s19 = scalar_lea.hbm %s303_s2, 128 }
  0xfa   :  { %p208_p5 = scmp.ne.s32.totalorder %s303_s2, %s207_s19  ;;  %p211_p6 = scmp.lt.u32.totalorder %s207_s19, %s303_s2 }
  0xfc   :  { %p213_p7 = pnand %p211_p6, %p208_p5 }
  0xfe   :  { %216 = shalt.err (!%p213_p7)
}
  0xff   :  { %110 = dma.vmem_to_hbm [thread:$0]  %s108_s16, 128, %s303_s2, [#allocation3]  }
 0x100   :  { %217 = dma.done.wait [#allocation3], 128  }
 0x101   :  { %218 = vsyncadd [#allocation3], 4294967168 }
 0x102   :  { %114 = vsyncpa [#allocation3], 1 }

</bundles_post_ra>
